<compile_context>
chip_gen: v7x
topology: tpu7x:2x2x1
jax: 0.10.0
libtpu: 0.0.40
codegen_flags: <defaults>
</compile_context>

<pallas_src>
import jax
import jax.numpy as jnp
from jax.experimental import pallas as pl
from jax.experimental.pallas import tpu as pltpu

LANES = 128          # vreg lane width; last dim of the slab
TILE_ROWS = 2048     # 2048 x 128 x 4B = 1 MiB per f32 tile (fits all scoped-VMEM defaults)


def _round_up(x: int, m: int) -> int:
    return (x + m - 1) // m * m


def _linear_kernel(w_ref, b_ref, x_ref, o_ref):
    # w_ref / b_ref: (1, 1) f32 in SMEM (scalar-broadcast path, hoisted reads).
    # x_ref / o_ref: (tile_rows, 128) f32 tiles in VMEM.
    w = w_ref[0, 0]
    b = b_ref[0, 0]
    o_ref[...] = x_ref[...] * w + b


def linear_regression_forward(
    data: jax.Array,
    weight: jax.Array,
    bias: jax.Array,
    *,
    tile_rows: int = TILE_ROWS,
    min_pallas_elems: int = LANES,
) -> jax.Array:
    """data: (N, 1) f32, weight: (1, 1) f32, bias: (1,) f32 -> (N, 1) f32."""
    n, in_features = data.shape
    w2 = jnp.asarray(weight, jnp.float32).reshape(1, 1)
    b2 = jnp.asarray(bias, jnp.float32).reshape(1, 1)

    # Tiny-batch fast path: pallas_call launch overhead dwarfs a handful of
    # FMAs; a plain fused jnp expression is strictly faster here.
    if n < min_pallas_elems:
        return data.astype(jnp.float32) * w2[0, 0] + b2[0, 0]

    # Lane-dense slab: pad N up so the flattened data reshapes to (R, 128)
    # with R an exact multiple of the row tile.
    r_raw = pl.cdiv(n, LANES)
    tr = max(8, _round_up(min(tile_rows, r_raw), 8))
    r = _round_up(r_raw, tr)
    padded = r * LANES

    flat = data.reshape(-1).astype(jnp.float32)
    slab = jnp.pad(flat, (0, padded - n)).reshape(r, LANES)

    out = pl.pallas_call(
        _linear_kernel,
        out_shape=jax.ShapeDtypeStruct((r, LANES), jnp.float32),
        grid=(r // tr,),
        in_specs=[
            # Scalars in SMEM: read once per step as w_ref[0, 0] / b_ref[0, 0].
            pl.BlockSpec(memory_space=pltpu.MemorySpace.SMEM),
            pl.BlockSpec(memory_space=pltpu.MemorySpace.SMEM),
            # Lane-dense, double-buffered row tiles.
            pl.BlockSpec((tr, LANES), lambda i: (i, 0)),
        ],
        out_specs=pl.BlockSpec((tr, LANES), lambda i: (i, 0)),
        compiler_params=pltpu.CompilerParams(
            dimension_semantics=("parallel",),  # shard row tiles across v7x's 2 TCs
        ),
    )(w2, b2, slab)

    # Drop the padded tail and restore the (N, 1) column layout.
    return out.reshape(-1)[:n].reshape(n, in_features)


class LinearRegressionModelClass:
    """JAX/Pallas mirror of the PyTorch module (nn.Linear(1, 1))."""

    def __init__(self, key: jax.Array):
        kw, kb = jax.random.split(key)
        # nn.Linear default init: U(-1/sqrt(fan_in), 1/sqrt(fan_in)), fan_in = 1.
        self.weight = jax.random.uniform(kw, (1, 1), jnp.float32, -1.0, 1.0)
        self.bias = jax.random.uniform(kb, (1,), jnp.float32, -1.0, 1.0)

    def __call__(self, data: jax.Array, **kwargs) -> jax.Array:
        return linear_regression_forward(data, self.weight, self.bias, **kwargs)


if __name__ == "__main__":
    key = jax.random.PRNGKey(0)
    k_params, k_small, k_mid, k_big = jax.random.split(key, 4)

    model = LinearRegressionModelClass(k_params)

    def ref(x):
        return x @ model.weight.T + model.bias

    # 1) Tiny batch (N=8): bypasses Pallas, XLA-fused w*x+b.
    x_small = jax.random.normal(k_small, (8, 1), dtype=jnp.float32)
    y_small = jax.block_until_ready(model(x_small))
    assert y_small.shape == (8, 1) and y_small.dtype == jnp.float32
    assert jnp.allclose(y_small, ref(x_small), atol=1e-6), "tiny-path mismatch"

    # 2) Kernel path, single lane-dense block (N=5000, exercises tail padding).
    x_mid = jax.random.normal(k_mid, (5000, 1), dtype=jnp.float32)
    y_mid = jax.block_until_ready(model(x_mid))
    assert y_mid.shape == (5000, 1) and y_mid.dtype == jnp.float32
    assert jnp.allclose(y_mid, ref(x_mid), atol=1e-6), "single-tile mismatch"

    # 3) Kernel path, multi-tile grid (N=8192 with a small test tile -> grid=(4,)).
    x_big = jax.random.normal(k_big, (8192, 1), dtype=jnp.float32)
    y_big = jax.block_until_ready(model(x_big, tile_rows=16))
    assert y_big.shape == (8192, 1) and y_big.dtype == jnp.float32
    assert jnp.allclose(y_big, ref(x_big), atol=1e-6), "multi-tile mismatch"

    print("KERNEL_OK")
</pallas_src>

<mosaic_0001>
module attributes {stable_mosaic.version = 11 : i64} {
  func.func @_linear_kernel(%arg0: i32, %arg1: memref<1x1xf32, #tpu.memory_space<smem>>, %arg2: memref<1x1xf32, #tpu.memory_space<smem>>, %arg3: memref<40x128xf32, #tpu.memory_space<vmem>>, %arg4: memref<40x128xf32, #tpu.memory_space<vmem>>) attributes {dimension_semantics = [#tpu.dimension_semantics<parallel>], iteration_bounds = array<i64: 1>, scalar_prefetch = 0 : i64, scratch_operands = 0 : i64, tpu.core_type = #tpu.core_type<tc>, window_params = [{transform_indices = @transform_0, window_bounds = array<i64: 1, 1>}, {transform_indices = @transform_1, window_bounds = array<i64: 1, 1>}, {transform_indices = @transform_2, window_bounds = array<i64: 40, 128>}, {transform_indices = @transform_3, window_bounds = array<i64: 40, 128>}]} {
    %c0 = arith.constant 0 : index
    %c0_0 = arith.constant 0 : index
    %0 = memref.load %arg1[%c0, %c0_0] : memref<1x1xf32, #tpu.memory_space<smem>>
    %c0_1 = arith.constant 0 : index
    %c0_2 = arith.constant 0 : index
    %1 = memref.load %arg2[%c0_1, %c0_2] : memref<1x1xf32, #tpu.memory_space<smem>>
    %c0_3 = arith.constant 0 : index
    %c0_4 = arith.constant 0 : index
    %2 = vector.load %arg3[%c0_3, %c0_4] : memref<40x128xf32, #tpu.memory_space<vmem>>, vector<40x128xf32>
    %3 = vector.broadcast %0 : f32 to vector<40x128xf32>
    %4 = arith.mulf %2, %3 : vector<40x128xf32>
    %5 = vector.broadcast %1 : f32 to vector<40x128xf32>
    %6 = arith.addf %4, %5 : vector<40x128xf32>
    %c0_5 = arith.constant 0 : index
    %c0_6 = arith.constant 0 : index
    %7 = vector.load %arg4[%c0_5, %c0_6] : memref<40x128xf32, #tpu.memory_space<vmem>>, vector<40x128xf32>
    tpu.vector_store %arg4[%c0_5, %c0_6], %6 {strides = array<i32>} : memref<40x128xf32, #tpu.memory_space<vmem>>, vector<40x128xf32>,
    return
  }
  func.func @transform_0(%arg0: i32) -> (i32, i32) {
    %c0_i32 = arith.constant 0 : i32
    %c0_i32_0 = arith.constant 0 : i32
    %c0_i32_1 = arith.constant 0 : i32
    return %c0_i32, %c0_i32_0 : i32, i32
  }
  func.func @transform_1(%arg0: i32) -> (i32, i32) {
    %c0_i32 = arith.constant 0 : i32
    %c0_i32_0 = arith.constant 0 : i32
    %c0_i32_1 = arith.constant 0 : i32
    return %c0_i32, %c0_i32_0 : i32, i32
  }
  func.func @transform_2(%arg0: i32) -> (i32, i32) {
    %c0_i32 = arith.constant 0 : i32
    %c0_i32_0 = arith.constant 0 : i32
    return %arg0, %c0_i32 : i32, i32
  }
  func.func @transform_3(%arg0: i32) -> (i32, i32) {
    %c0_i32 = arith.constant 0 : i32
    %c0_i32_0 = arith.constant 0 : i32
    return %arg0, %c0_i32 : i32, i32
  }
}

</mosaic_0001>

<bundles_post_ra>
// kernel: tpu_custom_call.1
= control target key start
LH: loop header
LB: loop body
LE: loop exit
PB: predicated region body
PF: predicated region fallthrough
CT: control target
= control target key end

     0   :  { %10 = vsyncpa [#allocation5], 0  ;;  %s184_s0 = inlined_call_operand.<no memory space> [shape: f32[1,1], index: 0, kind: input, shape index: {}]   ;;  %s185_s1 = inlined_call_operand.<no memory space> [shape: f32[1,1], index: 1, kind: input, shape index: {}]   ;;  %s186_s2 = inlined_call_operand.hbm [shape: f32[40,128], index: 2, kind: input, shape index: {}]   ;;  %s187_s3 = inlined_call_operand.hbm [shape: f32[40,128], index: 3, kind: output, shape index: {}]  }
   0x1   :  { %11 = vsyncpa [#allocation6], 0  ;;  %s124_s12 = smov [#allocation4]   ;;  %s76_s16 = scalar_lea.hbm %s186_s2, 640 }
   0x2   :  { %s21_s13 = sshll.u32 %s124_s12, 4  ;;  %p77_p0 = scmp.ne.s32.totalorder %s186_s2, %s76_s16  ;;  %s22_s13 = int_to_ptr.vmem [resolvable:$true] %s21_s13 }
   0x3   :  { %p80_p1 = scmp.lt.u32.totalorder %s76_s16, %s186_s2 }
   0x5   :  { %p82_p2 = pnand %p80_p1, %p77_p0 }
   0x7   :  { %85 = shalt.err (!%p82_p2)
}
   0x8   :  { %s86_s21 = scalar_lea.vmem %s22_s13, 640  ;;  %p91_p4 = scmp.lt.s32.totalorder %s22_s13, %s22_s13 }
   0x9   :  { %p87_p3 = scmp.ne.s32.totalorder %s22_s13, %s86_s21  ;;  %p92_p5 = scmp.lt.s32.totalorder %s86_s21, %s86_s21 }
   0xb   :  { %p93_p6 = por %p92_p5, %p91_p4 }
   0xd   :  { %p94_p7 = pnand %p93_p6, %p87_p3 }
   0xf   :  { %97 = shalt.err (!%p94_p7)
}
  0x10   :  { %s125_s22 = smov 128   ;;  %s126_s23 = smov 8  }
  0x11   :  { %27 = dma.hbm_to_vmem [thread:$0]  %s186_s2, 640, %s22_s13, [#allocation5], %s125_s22, %s125_s22, %s126_s23  }
  0x12   :  { %120 = dma.done.wait [#allocation5], 640  }
  0x13   :  { %121 = vsyncadd [#allocation5], 4294966656  ;;  %v38_v0 = vstv %s184_s0  ;;  %v33_v1 = vld [vmem:[#allocation4] sm:$0xff]  ;;  %v44_v2 = vstv %s185_s1  ;;  %v34_v3 = vld [vmem:[#allocation4 + $0x8] sm:$0xff]  ;;  %s127_s30 = smov [#allocation7]  }
  0x14   :  { %v35_v4 = vld [vmem:[#allocation4 + $0x10] sm:$0xff]  ;;  %v39_v5 = vmul.f32 %v38_v0, %v33_v1  ;;  %v40_v6 = vmul.f32 %v38_v0, %v34_v3  ;;  %v36_v8 = vld [vmem:[#allocation4 + $0x18] sm:$0xff]  ;;  %v37_v9 = vld [vmem:[#allocation4 + $0x20] sm:$0xff]  ;;  %s60_s2 = sshll.u32 %s127_s30, 4  ;;  %s61_s2 = int_to_ptr.vmem [resolvable:$true] %s60_s2 }
  0x15   :  { %v41_v7 = vmul.f32 %v38_v0, %v35_v4  ;;  %v42_v10 = vmul.f32 %v38_v0, %v36_v8  ;;  %v43_v11 = vmul.f32 %v38_v0, %v37_v9  ;;  %s98_s0 = scalar_lea.vmem %s61_s2, 640  ;;  %p103_p9 = scmp.lt.s32.totalorder %s61_s2, %s61_s2 }
  0x16   :  { %v45_v12 = vadd.f32 %v44_v2, %v39_v5  ;;  %v46_v13 = vadd.f32 %v44_v2, %v40_v6  ;;  %p99_p8 = scmp.ne.s32.totalorder %s61_s2, %s98_s0  ;;  %p104_p10 = scmp.lt.s32.totalorder %s98_s0, %s98_s0 }
  0x17   :  { %v47_v14 = vadd.f32 %v44_v2, %v41_v7  ;;  %v48_v15 = vadd.f32 %v44_v2, %v42_v10  ;;  %v49_v16 = vadd.f32 %v44_v2, %v43_v11 }
  0x18   :  { %50 = vst [vmem:[#allocation7] sm:$0xff] %v45_v12  ;;  %51 = vst [vmem:[#allocation7 + $0x8] sm:$0xff] %v46_v13  ;;  %p105_p11 = por %p104_p10, %p103_p9 }
  0x19   :  { %52 = vst [vmem:[#allocation7 + $0x10] sm:$0xff] %v47_v14  ;;  %53 = vst [vmem:[#allocation7 + $0x18] sm:$0xff] %v48_v15 }
  0x1a   :  { %54 = vst [vmem:[#allocation7 + $0x20] sm:$0xff] %v49_v16  ;;  %p106_p12 = pnand %p105_p11, %p99_p8 }
  0x1c   :  { %109 = shalt.err (!%p106_p12)
}
  0x1d   :  { %s110_s5 = scalar_lea.hbm %s187_s3, 640 }
  0x1e   :  { %p111_p13 = scmp.ne.s32.totalorder %s187_s3, %s110_s5  ;;  %p114_p0 = scmp.lt.u32.totalorder %s110_s5, %s187_s3 }
  0x20   :  { %p116_p1 = pnand %p114_p0, %p111_p13 }
  0x22   :  { %119 = shalt.err (!%p116_p1)
}
  0x23   :  { %66 = dma.vmem_to_hbm [thread:$0]  %s61_s2, 640, %s187_s3, [#allocation6], %s125_s22, %s125_s22, %s126_s23  }
  0x24   :  { %122 = dma.done.wait [#allocation6], 640  }
  0x25   :  { %123 = vsyncadd [#allocation6], 4294966656 }
  0x26   :  { %70 = vsyncpa [#allocation5], 1 }
  0x27   :  { %71 = vsyncpa [#allocation6], 1 }

</bundles_post_ra>
